<compile_context>
chip_gen: v6e
topology: v6e:2x2x1
jax: 0.10.0
libtpu: 0.0.40
codegen_flags: <defaults>
</compile_context>

<pallas_src>
import numpy as np
import jax
import jax.numpy as jnp
from jax.experimental import pallas as pl
from jax.experimental.pallas import tpu as pltpu

H1 = 20       # h1_dim (fixed by the module)
H2 = 10       # h2_dim (fixed by the module)
LANES = 128

# trimmed contraction band sizes (rows) of the packed parameter slab
L2_ROWS = 64   # holds 3*H1 = 60 used rows (fused layer-2, block diagonal)
L3_ROWS = 32   # holds 3*H2 = 30 used rows (fused layer-3 + mu/log_var heads)
HD_ROWS = 16   # holds H2   = 10 used rows (q_c head)
B_ROWS = 8     # 4 bias rows used


def _round_up(n, m):
    return ((n + m - 1) // m) * m


def _row_offsets(dim):
    """Row layout of the packed parameter slab (all bands 8-row aligned)."""
    a = _round_up(dim, 8)            # fused layer-1 weight band
    b_w2 = a
    b_w3 = b_w2 + L2_ROWS
    b_w4 = b_w3 + L3_ROWS
    b_b = b_w4 + HD_ROWS
    total = b_b + B_ROWS
    return b_w2, b_w3, b_w4, b_b, total


def make_vi_kernel(dim, K, out_lanes):
    b_w2, b_w3, b_w4, b_b, _ = _row_offsets(dim)
    kd = K * dim
    # NOTE: Mosaic only lowers DEFAULT / HIGHEST dot precision; HIGH (bf16x3)
    # is not available, and DEFAULT is risky against the 1e-3 tolerance since
    # the head output is squared before the softmax -> keep HIGHEST.
    P = jax.lax.Precision.HIGHEST

    def dot(a, b):
        return jnp.dot(a, b, precision=P, preferred_element_type=jnp.float32)

    def kernel(p_ref, xe_ref, out_ref):
        xe = xe_ref[...]                      # (bt, IN_LANES): [x | eps (k-major)]
        x = xe[:, 0:dim]                      # (bt, dim)

        # fused layer 1: lanes [0:20)=q_c, [20:40)=q_mu, [40:60)=q_log_var
        h1 = jnp.maximum(dot(x, p_ref[0:dim, :]) + p_ref[b_b:b_b + 1, :], 0.0)
        # fused layer 2 (block diagonal): lanes [0:10) / [10:20) / [20:30)
        h2 = jnp.maximum(
            dot(h1[:, :L2_ROWS], p_ref[b_w2:b_w2 + L2_ROWS, :])
            + p_ref[b_b + 1:b_b + 2, :], 0.0)
        # fused layer 3: lanes [0:10)=q_c pre-ReLU, [10:13)=mu, [13:16)=log_var
        r3 = (dot(h2[:, :L3_ROWS], p_ref[b_w3:b_w3 + L3_ROWS, :])
              + p_ref[b_b + 2:b_b + 3, :])

        # q_c head: rows >= H2 of the head band are zero, so ReLU'ing the
        # mu/log_var lanes in h3 contributes nothing.
        h3 = jnp.maximum(r3[:, :HD_ROWS], 0.0)                        # (bt, 16)
        pf = (dot(h3, p_ref[b_w4:b_w4 + HD_ROWS, :])
              + p_ref[b_b + 3:b_b + 4, :])                            # (bt, 128)

        # square + softmax over K, elementwise across the K lane slices
        sq = [pf[:, k * dim:(k + 1) * dim] for k in range(K)]
        sq = [v * v for v in sq]
        m = sq[0]
        for v in sq[1:]:
            m = jnp.maximum(m, v)
        ek = [jnp.exp(v - m) for v in sq]
        den = ek[0]
        for v in ek[1:]:
            den = den + v
        inv = 1.0 / den
        phi = [v * inv for v in ek]                                   # K x (bt, dim)

        # reparameterize on the VPU (no trailing MXU round trip):
        #   z = sum_k (mu_k + sigma_k * eps_k) * phi_k
        ml = r3[:, H2:H2 + 2 * K]                                     # (bt, 2K) = [mu|log_var]
        sg = jnp.exp(0.5 * ml[:, K:2 * K]) + 1e-5                     # (bt, K)  = sigma
        z = None
        for k in range(K):
            eps_k = xe[:, dim + k * dim:dim + (k + 1) * dim]          # (bt, dim)
            term = (ml[:, k:k + 1] + sg[:, k:k + 1] * eps_k) * phi[k]
            z = term if z is None else z + term                       # (bt, dim)

        # pack everything into one lane-dense block -> single unmasked store
        pieces = phi + [z, ml]
        used = kd + dim + 2 * K
        if out_lanes > used:
            pieces.append(jnp.zeros((x.shape[0], out_lanes - used), jnp.float32))
        out_ref[...] = jnp.concatenate(pieces, axis=1)

    return kernel


def vi_forward_batched(xb, param_slab, eps_bkd, *, block_batch=8):
    """Batched forward.
    xb: (B, dim) f32; param_slab: pack_params(...); eps_bkd: (B, K, dim) f32
    (the randn_like(phi) draw, with eps_bkd[b, k, d] <-> torch eps[d, k]).
    Returns (z (B,dim), mu (B,K), log_var (B,K), phi (B,dim,K))."""
    B, dim = xb.shape
    K = eps_bkd.shape[1]
    assert eps_bkd.shape == (B, K, dim)
    assert dim % 8 == 0 and dim <= LANES and K * dim <= LANES
    assert 3 * H1 <= L2_ROWS and 3 * H2 <= L3_ROWS and H2 <= HD_ROWS
    assert block_batch % 8 == 0

    *_, rows = _row_offsets(dim)
    assert param_slab.shape == (rows, LANES)

    in_lanes = _round_up((K + 1) * dim, LANES)
    out_lanes = _round_up((K + 1) * dim + 2 * K, LANES)
    bp = _round_up(B, block_batch)

    # single lane-dense input block: lanes [0:dim)=x, [dim:dim+K*dim)=eps (k-major)
    xe = jnp.concatenate([xb, eps_bkd.reshape(B, K * dim)], axis=1)
    xe = jnp.pad(xe.astype(jnp.float32),
                 ((0, bp - B), (0, in_lanes - (K + 1) * dim)))

    out = pl.pallas_call(
        make_vi_kernel(dim, K, out_lanes),
        out_shape=jax.ShapeDtypeStruct((bp, out_lanes), jnp.float32),
        grid_spec=pltpu.PrefetchScalarGridSpec(
            num_scalar_prefetch=0,
            grid=(bp // block_batch,),
            in_specs=[
                # param slab: constant block index -> DMA'd once, resident in VMEM
                pl.BlockSpec((rows, LANES), lambda i: (0, 0)),
                pl.BlockSpec((block_batch, in_lanes), lambda i: (i, 0)),
            ],
            out_specs=pl.BlockSpec((block_batch, out_lanes), lambda i: (i, 0)),
        ),
        compiler_params=pltpu.CompilerParams(
            dimension_semantics=("parallel",),   # v7x: shard samples over 2 TCs
        ),
    )(param_slab, xe)

    out = out[:B]
    kd = K * dim
    phi = jnp.transpose(out[:, :kd].reshape(B, K, dim), (0, 2, 1))   # (B, dim, K)
    z = out[:, kd:kd + dim]                                          # (B, dim)
    mu = out[:, kd + dim:kd + dim + K]                               # (B, K)
    log_var = out[:, kd + dim + K:kd + dim + 2 * K]                  # (B, K)
    return z, mu, log_var, phi


def vi_forward(x, param_slab, eps_kd, *, block_batch=8):
    """Single-sample forward matching the PyTorch module contract.
    x: (dim,); eps_kd: (K, dim). Returns (z (dim,), mu (K,), log_var (K,), phi (dim,K))."""
    z, mu, lv, phi = vi_forward_batched(x[None], param_slab, eps_kd[None],
                                        block_batch=block_batch)
    return z[0], mu[0], lv[0], phi[0]


def init_params(key, dim, K=3):
    """Deterministic synthetic parameters (PyTorch-Linear-style uniform init)."""
    def dense(k, fan_in, fan_out):
        kw, kb = jax.random.split(k)
        s = 1.0 / float(np.sqrt(fan_in))
        w = jax.random.uniform(kw, (fan_in, fan_out), jnp.float32, -s, s)
        b = jax.random.uniform(kb, (1, fan_out), jnp.float32, -s, s)
        return w, b

    ks = jax.random.split(key, 10)
    p = {}
    p["wc1"], p["bc1"] = dense(ks[0], dim, H1)
    p["wc2"], p["bc2"] = dense(ks[1], H1, H2)
    p["wc3"], p["bc3"] = dense(ks[2], H2, H2)
    p["wc4"], p["bc4"] = dense(ks[3], H2, K * dim)   # flat head; column = d*K + k
    p["wm1"], p["bm1"] = dense(ks[4], dim, H1)
    p["wm2"], p["bm2"] = dense(ks[5], H1, H2)
    p["wm3"], p["bm3"] = dense(ks[6], H2, K)
    p["wv1"], p["bv1"] = dense(ks[7], dim, H1)
    p["wv2"], p["bv2"] = dense(ks[8], H1, H2)
    p["wv3"], p["bv3"] = dense(ks[9], H2, K)
    return p


def pack_params(p, dim, K):
    """Pack all weights/biases into one lane-dense (rows, 128) f32 slab (done once)."""
    b_w2, b_w3, b_w4, b_b, rows = _row_offsets(dim)
    g = lambda n: np.asarray(p[n], np.float32)
    slab = np.zeros((rows, LANES), np.float32)

    # fused layer 1: (dim, 3*H1)
    slab[0:dim, 0:H1] = g("wc1")
    slab[0:dim, H1:2 * H1] = g("wm1")
    slab[0:dim, 2 * H1:3 * H1] = g("wv1")
    # fused layer 2 (block diagonal), 64-row band
    slab[b_w2:b_w2 + H1, 0:H2] = g("wc2")
    slab[b_w2 + H1:b_w2 + 2 * H1, H2:2 * H2] = g("wm2")
    slab[b_w2 + 2 * H1:b_w2 + 3 * H1, 2 * H2:3 * H2] = g("wv2")
    # fused layer 3 (q_c third layer + q_mu head + q_log_var head), 32-row band
    slab[b_w3:b_w3 + H2, 0:H2] = g("wc3")
    slab[b_w3 + H2:b_w3 + 2 * H2, H2:H2 + K] = g("wm3")
    slab[b_w3 + 2 * H2:b_w3 + 3 * H2, H2 + K:H2 + 2 * K] = g("wv3")
    # q_c head, re-laid out k-major (new col k*dim+d <- flat col d*K+k), 16-row band
    wc4_km = g("wc4").reshape(H2, dim, K).transpose(0, 2, 1).reshape(H2, K * dim)
    bc4_km = g("bc4").reshape(dim, K).T.reshape(K * dim)
    slab[b_w4:b_w4 + H2, 0:K * dim] = wc4_km
    # bias rows
    slab[b_b, 0:H1] = g("bc1")[0]
    slab[b_b, H1:2 * H1] = g("bm1")[0]
    slab[b_b, 2 * H1:3 * H1] = g("bv1")[0]
    slab[b_b + 1, 0:H2] = g("bc2")[0]
    slab[b_b + 1, H2:2 * H2] = g("bm2")[0]
    slab[b_b + 1, 2 * H2:3 * H2] = g("bv2")[0]
    slab[b_b + 2, 0:H2] = g("bc3")[0]
    slab[b_b + 2, H2:H2 + K] = g("bm3")[0]
    slab[b_b + 2, H2 + K:H2 + 2 * K] = g("bv3")[0]
    slab[b_b + 3, 0:K * dim] = bc4_km
    return jnp.asarray(slab)


def vi_forward_ref(xb, params, eps_bkd):
    """Pure-JAX batched reference mirroring the PyTorch forward exactly."""
    P = jax.lax.Precision.HIGHEST
    lin = lambda a, w, b: jnp.dot(a, w, precision=P) + b
    relu = lambda t: jnp.maximum(t, 0.0)
    B, dim = xb.shape
    K = eps_bkd.shape[1]

    h = relu(lin(xb, params["wc1"], params["bc1"]))
    h = relu(lin(h, params["wc2"], params["bc2"]))
    h = relu(lin(h, params["wc3"], params["bc3"]))
    phi = lin(h, params["wc4"], params["bc4"]) ** 2          # (B, K*dim), col d*K+k
    phi = phi.reshape(B, dim, K)
    phi = jax.nn.softmax(phi, axis=-1)

    hm = relu(lin(xb, params["wm1"], params["bm1"]))
    hm = relu(lin(hm, params["wm2"], params["bm2"]))
    mu = lin(hm, params["wm3"], params["bm3"])               # (B, K)

    hv = relu(lin(xb, params["wv1"], params["bv1"]))
    hv = relu(lin(hv, params["wv2"], params["bv2"]))
    log_var = lin(hv, params["wv3"], params["bv3"])          # (B, K)

    sigma = jnp.exp(0.5 * log_var) + 1e-5
    eps_dk = jnp.transpose(eps_bkd, (0, 2, 1))               # (B, dim, K) == randn_like(phi)
    z = ((mu[:, None, :] + sigma[:, None, :] * eps_dk) * phi).sum(axis=-1)
    return z, mu, log_var, phi


if __name__ == "__main__":
    dim, K, B = 32, 3, 16
    key = jax.random.PRNGKey(0)
    kx, keps, kp = jax.random.split(key, 3)
    xb = jax.random.normal(kx, (B, dim), jnp.float32)
    # eps is the torch.randn_like(phi) draw, generated in plain JAX as (B, K, dim).
    eps = jax.random.normal(keps, (B, K, dim), jnp.float32)
    params = init_params(kp, dim, K)
    slab = pack_params(params, dim, K)            # built once, reused every call

    names = ("z", "mu", "log_var", "phi")
    ref = vi_forward_ref(xb, params, eps)

    # batched path (grid over sample blocks, param slab resident in VMEM)
    fwd = jax.jit(vi_forward_batched, static_argnames=("block_batch",))
    out = jax.block_until_ready(fwd(xb, slab, eps, block_batch=8))
    for name, a, b in zip(names, out, ref):
        assert a.shape == b.shape, (name, a.shape, b.shape)
        err = float(jnp.max(jnp.abs(a - b)))
        assert jnp.allclose(a, b, atol=1e-3, rtol=1e-3), (name, err)

    # single-sample path (the module's literal contract)
    single = jax.jit(vi_forward)
    out1 = jax.block_until_ready(single(xb[0], slab, eps[0]))
    for name, a, b in zip(names, out1, ref):
        b0 = b[0]
        assert a.shape == b0.shape, (name, a.shape, b0.shape)
        err = float(jnp.max(jnp.abs(a - b0)))
        assert jnp.allclose(a, b0, atol=1e-3, rtol=1e-3), (name, err)

    print("KERNEL_OK")
</pallas_src>

<mosaic_0001>
module attributes {stable_mosaic.version = 11 : i64} {
  func.func @kernel(%arg0: i32, %arg1: memref<152x128xf32, #tpu.memory_space<vmem>>, %arg2: memref<8x128xf32, #tpu.memory_space<vmem>>, %arg3: memref<8x256xf32, #tpu.memory_space<vmem>>) attributes {dimension_semantics = [#tpu.dimension_semantics<parallel>], iteration_bounds = array<i64: 2>, scalar_prefetch = 0 : i64, scratch_operands = 0 : i64, tpu.core_type = #tpu.core_type<tc>, window_params = [{pipeline_mode = #tpu.pipeline_mode<synchronous>, transform_indices = @transform_0, window_bounds = array<i64: 152, 128>}, {transform_indices = @transform_1, window_bounds = array<i64: 8, 128>}, {transform_indices = @transform_2, window_bounds = array<i64: 8, 256>}]} {
    %c0 = arith.constant 0 : index
    %c0_0 = arith.constant 0 : index
    %0 = vector.load %arg2[%c0, %c0_0] : memref<8x128xf32, #tpu.memory_space<vmem>>, vector<8x128xf32>
    %1 = vector.extract_strided_slice %0 {offsets = [0, 0], sizes = [8, 32], strides = [1, 1]} : vector<8x128xf32> to vector<8x32xf32>
    %c0_1 = arith.constant 0 : index
    %c0_2 = arith.constant 0 : index
    %2 = vector.load %arg1[%c0_1, %c0_2] : memref<152x128xf32, #tpu.memory_space<vmem>>, vector<32x128xf32>
    %cst = arith.constant dense<0.000000e+00> : vector<8x128xf32>
    %3 = tpu.matmul %1, %2, %cst {dimension_numbers = #tpu.dot_dimension_numbers<[1], [0], [0], [1], [0, 0, 1, 1], [], []>, precision = #tpu.contract_precision<fp32>} : vector<8x32xf32>, vector<32x128xf32>, vector<8x128xf32> -> vector<8x128xf32>
    %c144 = arith.constant 144 : index
    %c0_3 = arith.constant 0 : index
    %4 = vector.load %arg1[%c144, %c0_3] : memref<152x128xf32, #tpu.memory_space<vmem>>, vector<1x128xf32>
    %5 = vector.broadcast %4 : vector<1x128xf32> to vector<8x128xf32>
    %6 = arith.addf %3, %5 : vector<8x128xf32>
    %cst_4 = arith.constant 0.000000e+00 : f32
    %7 = vector.broadcast %cst_4 : f32 to vector<8x128xf32>
    %8 = arith.maximumf %6, %7 : vector<8x128xf32>
    %9 = vector.extract_strided_slice %8 {offsets = [0, 0], sizes = [8, 64], strides = [1, 1]} : vector<8x128xf32> to vector<8x64xf32>
    %c32 = arith.constant 32 : index
    %c0_5 = arith.constant 0 : index
    %10 = vector.load %arg1[%c32, %c0_5] : memref<152x128xf32, #tpu.memory_space<vmem>>, vector<64x128xf32>
    %cst_6 = arith.constant dense<0.000000e+00> : vector<8x128xf32>
    %11 = tpu.matmul %9, %10, %cst_6 {dimension_numbers = #tpu.dot_dimension_numbers<[1], [0], [0], [1], [0, 0, 1, 1], [], []>, precision = #tpu.contract_precision<fp32>} : vector<8x64xf32>, vector<64x128xf32>, vector<8x128xf32> -> vector<8x128xf32>
    %c145 = arith.constant 145 : index
    %c0_7 = arith.constant 0 : index
    %12 = vector.load %arg1[%c145, %c0_7] : memref<152x128xf32, #tpu.memory_space<vmem>>, vector<1x128xf32>
    %13 = vector.broadcast %12 : vector<1x128xf32> to vector<8x128xf32>
    %14 = arith.addf %11, %13 : vector<8x128xf32>
    %cst_8 = arith.constant 0.000000e+00 : f32
    %15 = vector.broadcast %cst_8 : f32 to vector<8x128xf32>
    %16 = arith.maximumf %14, %15 : vector<8x128xf32>
    %17 = vector.extract_strided_slice %16 {offsets = [0, 0], sizes = [8, 32], strides = [1, 1]} : vector<8x128xf32> to vector<8x32xf32>
    %c96 = arith.constant 96 : index
    %c0_9 = arith.constant 0 : index
    %18 = vector.load %arg1[%c96, %c0_9] : memref<152x128xf32, #tpu.memory_space<vmem>>, vector<32x128xf32>
    %cst_10 = arith.constant dense<0.000000e+00> : vector<8x128xf32>
    %19 = tpu.matmul %17, %18, %cst_10 {dimension_numbers = #tpu.dot_dimension_numbers<[1], [0], [0], [1], [0, 0, 1, 1], [], []>, precision = #tpu.contract_precision<fp32>} : vector<8x32xf32>, vector<32x128xf32>, vector<8x128xf32> -> vector<8x128xf32>
    %c146 = arith.constant 146 : index
    %c0_11 = arith.constant 0 : index
    %20 = vector.load %arg1[%c146, %c0_11] : memref<152x128xf32, #tpu.memory_space<vmem>>, vector<1x128xf32>
    %21 = vector.broadcast %20 : vector<1x128xf32> to vector<8x128xf32>
    %22 = arith.addf %19, %21 : vector<8x128xf32>
    %23 = vector.extract_strided_slice %22 {offsets = [0, 0], sizes = [8, 16], strides = [1, 1]} : vector<8x128xf32> to vector<8x16xf32>
    %cst_12 = arith.constant 0.000000e+00 : f32
    %24 = vector.broadcast %cst_12 : f32 to vector<8x16xf32>
    %25 = arith.maximumf %23, %24 : vector<8x16xf32>
    %c128 = arith.constant 128 : index
    %c0_13 = arith.constant 0 : index
    %26 = vector.load %arg1[%c128, %c0_13] : memref<152x128xf32, #tpu.memory_space<vmem>>, vector<16x128xf32>
    %cst_14 = arith.constant dense<0.000000e+00> : vector<8x128xf32>
    %27 = tpu.matmul %25, %26, %cst_14 {dimension_numbers = #tpu.dot_dimension_numbers<[1], [0], [0], [1], [0, 0, 1, 1], [], []>, precision = #tpu.contract_precision<fp32>} : vector<8x16xf32>, vector<16x128xf32>, vector<8x128xf32> -> vector<8x128xf32>
    %c147 = arith.constant 147 : index
    %c0_15 = arith.constant 0 : index
    %28 = vector.load %arg1[%c147, %c0_15] : memref<152x128xf32, #tpu.memory_space<vmem>>, vector<1x128xf32>
    %29 = vector.broadcast %28 : vector<1x128xf32> to vector<8x128xf32>
    %30 = arith.addf %27, %29 : vector<8x128xf32>
    %31 = vector.extract_strided_slice %30 {offsets = [0, 0], sizes = [8, 32], strides = [1, 1]} : vector<8x128xf32> to vector<8x32xf32>
    %32 = vector.extract_strided_slice %30 {offsets = [0, 32], sizes = [8, 32], strides = [1, 1]} : vector<8x128xf32> to vector<8x32xf32>
    %33 = vector.extract_strided_slice %30 {offsets = [0, 64], sizes = [8, 32], strides = [1, 1]} : vector<8x128xf32> to vector<8x32xf32>
    %34 = arith.mulf %31, %31 : vector<8x32xf32>
    %35 = arith.mulf %32, %32 : vector<8x32xf32>
    %36 = arith.mulf %33, %33 : vector<8x32xf32>
    %37 = arith.maximumf %34, %35 : vector<8x32xf32>
    %38 = arith.maximumf %37, %36 : vector<8x32xf32>
    %39 = arith.subf %34, %38 : vector<8x32xf32>
    %40 = math.exp %39 : vector<8x32xf32>
    %41 = arith.subf %35, %38 : vector<8x32xf32>
    %42 = math.exp %41 : vector<8x32xf32>
    %43 = arith.subf %36, %38 : vector<8x32xf32>
    %44 = math.exp %43 : vector<8x32xf32>
    %45 = arith.addf %40, %42 : vector<8x32xf32>
    %46 = arith.addf %45, %44 : vector<8x32xf32>
    %cst_16 = arith.constant 1.000000e+00 : f32
    %47 = vector.broadcast %cst_16 : f32 to vector<8x32xf32>
    %48 = arith.divf %47, %46 : vector<8x32xf32>
    %49 = arith.mulf %40, %48 : vector<8x32xf32>
    %50 = arith.mulf %42, %48 : vector<8x32xf32>
    %51 = arith.mulf %44, %48 : vector<8x32xf32>
    %52 = vector.extract_strided_slice %22 {offsets = [0, 10], sizes = [8, 6], strides = [1, 1]} : vector<8x128xf32> to vector<8x6xf32>
    %53 = vector.extract_strided_slice %52 {offsets = [0, 3], sizes = [8, 3], strides = [1, 1]} : vector<8x6xf32> to vector<8x3xf32>
    %cst_17 = arith.constant 5.000000e-01 : f32
    %54 = vector.broadcast %cst_17 : f32 to vector<8x3xf32>
    %55 = arith.mulf %54, %53 : vector<8x3xf32>
    %56 = math.exp %55 : vector<8x3xf32>
    %cst_18 = arith.constant 9.99999974E-6 : f32
    %57 = vector.broadcast %cst_18 : f32 to vector<8x3xf32>
    %58 = arith.addf %56, %57 : vector<8x3xf32>
    %59 = vector.extract_strided_slice %0 {offsets = [0, 32], sizes = [8, 32], strides = [1, 1]} : vector<8x128xf32> to vector<8x32xf32>
    %60 = vector.extract_strided_slice %52 {offsets = [0, 0], sizes = [8, 1], strides = [1, 1]} : vector<8x6xf32> to vector<8x1xf32>
    %61 = vector.extract_strided_slice %58 {offsets = [0, 0], sizes = [8, 1], strides = [1, 1]} : vector<8x3xf32> to vector<8x1xf32>
    %62 = vector.broadcast %61 : vector<8x1xf32> to vector<8x32xf32>
    %63 = arith.mulf %62, %59 : vector<8x32xf32>
    %64 = vector.broadcast %60 : vector<8x1xf32> to vector<8x32xf32>
    %65 = arith.addf %64, %63 : vector<8x32xf32>
    %66 = arith.mulf %65, %49 : vector<8x32xf32>
    %67 = vector.extract_strided_slice %0 {offsets = [0, 64], sizes = [8, 32], strides = [1, 1]} : vector<8x128xf32> to vector<8x32xf32>
    %68 = vector.extract_strided_slice %52 {offsets = [0, 1], sizes = [8, 1], strides = [1, 1]} : vector<8x6xf32> to vector<8x1xf32>
    %69 = vector.extract_strided_slice %58 {offsets = [0, 1], sizes = [8, 1], strides = [1, 1]} : vector<8x3xf32> to vector<8x1xf32>
    %70 = vector.broadcast %69 : vector<8x1xf32> to vector<8x32xf32>
    %71 = arith.mulf %70, %67 : vector<8x32xf32>
    %72 = vector.broadcast %68 : vector<8x1xf32> to vector<8x32xf32>
    %73 = arith.addf %72, %71 : vector<8x32xf32>
    %74 = arith.mulf %73, %50 : vector<8x32xf32>
    %75 = arith.addf %66, %74 : vector<8x32xf32>
    %76 = vector.extract_strided_slice %0 {offsets = [0, 96], sizes = [8, 32], strides = [1, 1]} : vector<8x128xf32> to vector<8x32xf32>
    %77 = vector.extract_strided_slice %52 {offsets = [0, 2], sizes = [8, 1], strides = [1, 1]} : vector<8x6xf32> to vector<8x1xf32>
    %78 = vector.extract_strided_slice %58 {offsets = [0, 2], sizes = [8, 1], strides = [1, 1]} : vector<8x3xf32> to vector<8x1xf32>
    %79 = vector.broadcast %78 : vector<8x1xf32> to vector<8x32xf32>
    %80 = arith.mulf %79, %76 : vector<8x32xf32>
    %81 = vector.broadcast %77 : vector<8x1xf32> to vector<8x32xf32>
    %82 = arith.addf %81, %80 : vector<8x32xf32>
    %83 = arith.mulf %82, %51 : vector<8x32xf32>
    %84 = arith.addf %75, %83 : vector<8x32xf32>
    %cst_19 = arith.constant 0.000000e+00 : f32
    %85 = vector.broadcast %cst_19 : f32 to vector<8x122xf32>
    %86 = tpu.concatenate %49, %50, %51, %84, %52, %85 in 1 : vector<8x32xf32>, vector<8x32xf32>, vector<8x32xf32>, vector<8x32xf32>, vector<8x6xf32>, vector<8x122xf32> -> vector<8x256xf32>
    %c0_20 = arith.constant 0 : index
    %c0_21 = arith.constant 0 : index
    %87 = vector.load %arg3[%c0_20, %c0_21] : memref<8x256xf32, #tpu.memory_space<vmem>>, vector<8x256xf32>
    tpu.vector_store %arg3[%c0_20, %c0_21], %86 {strides = array<i32>} : memref<8x256xf32, #tpu.memory_space<vmem>>, vector<8x256xf32>,
    return
  }
  func.func @transform_0(%arg0: i32) -> (i32, i32) {
    %c0_i32 = arith.constant 0 : i32
    %c0_i32_0 = arith.constant 0 : i32
    %c0_i32_1 = arith.constant 0 : i32
    return %c0_i32, %c0_i32_0 : i32, i32
  }
  func.func @transform_1(%arg0: i32) -> (i32, i32) {
    %c0_i32 = arith.constant 0 : i32
    %c0_i32_0 = arith.constant 0 : i32
    return %arg0, %c0_i32 : i32, i32
  }
  func.func @transform_2(%arg0: i32) -> (i32, i32) {
    %c0_i32 = arith.constant 0 : i32
    %c0_i32_0 = arith.constant 0 : i32
    return %arg0, %c0_i32 : i32, i32
  }
}

</mosaic_0001>

<bundles_post_ra>
// kernel: vi_forward_batched.1
= control target key start
LH: loop header
LB: loop body
LE: loop exit
PB: predicated region body
PF: predicated region fallthrough
CT: control target
= control target key end

     0   :  { %s2851_s9 = smov 0   ;;  %s3355_s0 = inlined_call_operand.vmem [shape: f32[152,128], index: 0, kind: input, shape index: {}]   ;;  %s3356_s1 = inlined_call_operand.vmem [shape: f32[16,128], index: 1, kind: input, shape index: {}]   ;;  %s3357_s2 = inlined_call_operand.vmem [shape: f32[16,256], index: 2, kind: output, shape index: {}]  }
   0x1 LB: > { %s2343_s10 = sadd.s32 4294967295, %s2822_s9   ;;  %p2347_p0 = scmp.ge.s32.totalorder %s2822_s9, 1  ;;  %s2822_s9 = sphi %s2851_s9, %s12_s9  }
   0x2   : > { %p111_p1 = scmp.lt.s32.totalorder %s2822_s9, 3 }
   0x4   : > { %p112_p2 = pnand %p2347_p0, %p111_p1 }
   0x5   : > { %p132_p3 = scmp.lt.s32.totalorder (!%p112_p2), %s2343_s10, 1  ;;  %s2826_s6 = smov (!%p112_p2), 96  }
   0x6   : > { %115 = sbr.rel (%p112_p2) target bundleno = 1796 (0x704), region = 28  ;;  %s2827_s7 = smov (!%p112_p2), 64  }
   0x7   : > { %s2828_s8 = smov (!%p112_p2), 32   ;;  %s2835_s11 = smov (!%p112_p2), 118  }
   0xb   : > { %v145_v0 = vld [vmem:[%s3355_s0 + $0x18] sm:$0xff]  ;;  %v144_v1 = vld [vmem:[%s3355_s0 + $0x10] sm:$0xff]  ;;  %v143_v2 = vld [vmem:[%s3355_s0 + $0x8] sm:$0xff]  ;;  %v2824_v3 = vmov 0.0   ;;  %vm2825_vm0 = vmmov 0   ;;  %s3359_s10 = smov (!%p132_p3, %s2343_s10), 1 }
   0xc   : > { %2490 = vmatprep.subr.mxu0 %v2824_v3  ;;  %v2869_v4 = vand.u32 4294901760, %v145_v0  ;;  %2501 = vmatprep.subr.mxu1 %v2824_v3  ;;  %v2872_v5 = vand.u32 4294901760, %v144_v1  ;;  %v2874_v6 = vand.u32 4294901760, %v143_v2  ;;  %v142_v7 = vld [vmem:[%s3355_s0] sm:$0xff]  ;;  %s2348_s19 = sshll.u32 %s3359_s10, 3  ;;  %vm151_vm1 = vcmask 261120  }
   0xd   : > { %v2879_v8 = vand.u32 4294901760, %v142_v7  ;;  %2498 = vmatprep.mubr.msk.f32.mxu0 %vm2825_vm0, %v2824_v3  ;;  %2509 = vmatprep.mubr.msk.f32.mxu1 %vm2825_vm0, %v2824_v3  ;;  %s2906_s22 = scalar_lea.vmem %s3356_s1, %s2348_s19  ;;  %v648_v32 = vld [vmem:[%s3355_s0 + $0x58] sm:$0xff]  ;;  %v647_v34 = vld [vmem:[%s3355_s0 + $0x50] sm:$0xff]  ;;  %v646_v37 = vld [vmem:[%s3355_s0 + $0x48] sm:$0xff]  ;;  %vm654_vm2 = vcmask 523264   ;;  %vm1701_vm3 = vcmask 130048  }
   0xe   : > { %2491 = vmatpush3.msra.mxu0 %v2869_v4  ;;  %v260_v9 = vsub.f32 %v145_v0, %v2869_v4  ;;  %v2890_v10 = vsub.f32 %v144_v1, %v2872_v5  ;;  %v2893_v11 = vsub.f32 %v143_v2, %v2874_v6  ;;  %v141_v17 = vld [vmem:[%s2906_s22] sm:$0xff]  ;;  %v2965_v33 = vand.u32 4294901760, %v648_v32  ;;  %v644_v46 = vld [vmem:[%s3355_s0 + $0x38] sm:$0xff]  ;;  %v643_v52 = vld [vmem:[%s3355_s0 + $0x30] sm:$0xff] }
   0xf   : > { %2492 = vmatprep.subr.mxu0 %v2824_v3  ;;  %v2897_v12 = vsub.f32 %v142_v7, %v2879_v8  ;;  %v153_v21 = vsel %vm151_vm1, %v141_v17, 0  ;;  %v2973_v36 = vand.u32 4294901760, %v647_v34  ;;  %v2984_v40 = vand.u32 4294901760, %v646_v37  ;;  %v645_v41 = vld [vmem:[%s3355_s0 + $0x40] sm:$0xff]  ;;  %v642_v58 = vld [vmem:[%s3355_s0 + $0x28] sm:$0xff] }
  0x10   : > { %v261_v13 = vand.u32 4294901760, %v260_v9  ;;  %2493 = vmatpush3.msra.mxu0 %v2872_v5  ;;  %v268_v14 = vand.u32 4294901760, %v2890_v10  ;;  %v275_v15 = vand.u32 4294901760, %v2893_v11  ;;  %v224_v22 = vand.u32 4294901760, %v153_v21  ;;  %v641_v0 = vld [vmem:[%s3355_s0 + $0x20] sm:$0xff] }
  0x11   : > { %2494 = vmatprep.subr.mxu0 %v2824_v3  ;;  %v282_v16 = vand.u32 4294901760, %v2897_v12  ;;  %v2971_v35 = vsub.f32 %v648_v32, %v2965_v33  ;;  %v2982_v39 = vsub.f32 %v647_v34, %v2973_v36  ;;  %v2996_v44 = vsub.f32 %v646_v37, %v2984_v40 }
  0x12   : > { %v262_v18 = vsub.f32 %v260_v9, %v261_v13  ;;  %v269_v19 = vsub.f32 %v2890_v10, %v268_v14  ;;  %2495 = vmatpush3.msra.mxu0 %v2874_v6  ;;  %v276_v20 = vsub.f32 %v2893_v11, %v275_v15  ;;  %v225_v26 = vsub.f32 %v153_v21, %v224_v22  ;;  %v2351_v21 = vld [vmem:[%s3355_s0 + $0x90] ss:$0 sm:$0xff] }
  0x13   : > { %2496 = vmatprep.subr.mxu0 %v2824_v3  ;;  %v283_v25 = vsub.f32 %v2897_v12, %v282_v16  ;;  %v760_v38 = vand.u32 4294901760, %v2971_v35  ;;  %v767_v43 = vand.u32 4294901760, %v2982_v39  ;;  %v2998_v45 = vand.u32 4294901760, %v645_v41 }
  0x14   : > { %v263_v23 = vand.u32 4294901760, %v262_v18  ;;  %v270_v24 = vand.u32 4294901760, %v269_v19  ;;  %2497 = vmatpush3.msra.mxu0 %v2879_v8  ;;  %v277_v27 = vand.u32 4294901760, %v276_v20  ;;  %v226_v28 = vand.u32 4294901760, %v225_v26 }
  0x15   : > { %2512 = vmatprep.subr.mxu0 %v2824_v3  ;;  %v284_v29 = vand.u32 4294901760, %v283_v25  ;;  %v761_v42 = vsub.f32 %v2971_v35, %v760_v38  ;;  %v768_v48 = vsub.f32 %v2982_v39, %v767_v43  ;;  %v774_v49 = vand.u32 4294901760, %v2996_v44 }
  0x16   : > { %2502 = vmatpush3.msra.mxu1 %v263_v23  ;;  %v227_v30 = vsub.f32 %v225_v26, %v226_v28  ;;  %v3010_v50 = vsub.f32 %v645_v41, %v2998_v45  ;;  %v3013_v51 = vand.u32 4294901760, %v644_v46  ;;  %v3023_v56 = vand.u32 4294901760, %v643_v52 }
  0x17   : > { %2503 = vmatprep.subr.mxu1 %v2824_v3  ;;  %v762_v47 = vand.u32 4294901760, %v761_v42  ;;  %v769_v53 = vand.u32 4294901760, %v768_v48  ;;  %v775_v54 = vsub.f32 %v2996_v44, %v774_v49  ;;  %v3039_v62 = vand.u32 4294901760, %v642_v58 }
  0x18   : > { %2504 = vmatpush3.msra.mxu1 %v270_v24  ;;  %v228_v31 = vand.u32 4294901760, %v227_v30  ;;  %v781_v55 = vand.u32 4294901760, %v3010_v50  ;;  %v3027_v57 = vsub.f32 %v644_v46, %v3013_v51  ;;  %v3037_v61 = vsub.f32 %v643_v52, %v3023_v56 }
  0x19   : > { %2505 = vmatprep.subr.mxu1 %v2824_v3  ;;  %v776_v59 = vand.u32 4294901760, %v775_v54  ;;  %vm2284_vm4 = vcmask 48128   ;;  %vm2282_vm5 = vcmask 785408  }
  0x1a   : > { %2506 = vmatpush3.msra.mxu1 %v277_v27  ;;  %2499 = vmatmul.mubr.f32.vlgmr.msra.gmra.mxu0 %v228_v31  ;;  %v782_v60 = vsub.f32 %v3010_v50, %v781_v55  ;;  %v788_v63 = vand.u32 4294901760, %v3027_v57  ;;  %v795_v2 = vand.u32 4294901760, %v3037_v61 }
  0x1b   : > { %2507 = vmatprep.subr.mxu1 %v2824_v3  ;;  %2513 = vmatpush3.msra.mxu0 %v260_v9 }
  0x1c   : > { %2508 = vmatpush3.msra.mxu1 %v284_v29  ;;  %2514 = vmatprep.subr.mxu0 %v2824_v3  ;;  %v783_v1 = vand.u32 4294901760, %v782_v60  ;;  %v796_v7 = vsub.f32 %v3037_v61, %v795_v2 }
  0x1d   : > { %2510 = vmatmul.mubr.f32.vlgmr.msra.gmra.mxu1 %v224_v22  ;;  %2523 = vmatprep.subr.mxu1 %v2824_v3 }
  0x1e   : > { %2524 = vmatpush3.msra.mxu1 %v2869_v4  ;;  %2515 = vmatpush3.msra.mxu0 %v2890_v10 }
  0x1f   : > { %2525 = vmatprep.subr.mxu1 %v2824_v3  ;;  %2516 = vmatprep.subr.mxu0 %v2824_v3 }
  0x20   : > { %2526 = vmatpush3.msra.mxu1 %v2872_v5  ;;  %2517 = vmatpush3.msra.mxu0 %v2893_v11  ;;  %v797_v11 = vand.u32 4294901760, %v796_v7 }
  0x21   : > { %2527 = vmatprep.subr.mxu1 %v2824_v3  ;;  %2518 = vmatprep.subr.mxu0 %v2824_v3 }
  0x22   : > { %2528 = vmatpush3.msra.mxu1 %v2874_v6  ;;  %2519 = vmatpush3.msra.mxu0 %v2897_v12 }
  0x23   : > { %2520 = vmatprep.mubr.msk.f32.mxu0 %vm2825_vm0, %v2824_v3  ;;  %2529 = vmatprep.subr.mxu1 %v2824_v3 }
  0x24   : > { %2521 = vmatmul.mubr.f32.vlgmr.msra.gmra.mxu0 %v225_v26  ;;  %2530 = vmatpush3.msra.mxu1 %v2879_v8 }
  0x25   : > { %2531 = vmatprep.mubr.msk.f32.mxu1 %vm2825_vm0, %v2824_v3  ;;  %2534 = vmatprep.subr.mxu0 %v2824_v3 }
  0x26   : > { %2532 = vmatmul.mubr.f32.vlgmr.msra.gmra.mxu1 %v226_v28  ;;  %2535 = vmatpush3.msra.mxu0 %v261_v13 }
  0x27   : > { %2545 = vmatprep.subr.mxu1 %v2824_v3  ;;  %2536 = vmatprep.subr.mxu0 %v2824_v3 }
  0x28   : > { %2546 = vmatpush3.msra.mxu1 %v2869_v4  ;;  %2537 = vmatpush3.msra.mxu0 %v268_v14  ;;  %v3050_v4 = vsub.f32 %v642_v58, %v3039_v62 }
  0x29   : > { %2547 = vmatprep.subr.mxu1 %v2824_v3  ;;  %2538 = vmatprep.subr.mxu0 %v2824_v3 }
  0x2a   : > { %2548 = vmatpush3.msra.mxu1 %v2872_v5  ;;  %2539 = vmatpush3.msra.mxu0 %v275_v15  ;;  %v3052_v5 = vand.u32 4294901760, %v641_v0 }
  0x2b   : > { %2549 = vmatprep.subr.mxu1 %v2824_v3  ;;  %2540 = vmatprep.subr.mxu0 %v2824_v3 }
  0x2c   : > { %2550 = vmatpush3.msra.mxu1 %v2874_v6  ;;  %2541 = vmatpush3.msra.mxu0 %v282_v16  ;;  %v789_v6 = vsub.f32 %v3027_v57, %v788_v63  ;;  %v3065_v9 = vsub.f32 %v641_v0, %v3052_v5 }
  0x2d   : > { %2542 = vmatprep.mubr.msk.f32.mxu0 %vm2825_vm0, %v2824_v3  ;;  %2551 = vmatprep.subr.mxu1 %v2824_v3 }
  0x2e   : > { %2543 = vmatmul.mubr.f32.vlgmr.msra.gmra.mxu0 %v224_v22  ;;  %2552 = vmatpush3.msra.mxu1 %v2879_v8  ;;  %v802_v8 = vand.u32 4294901760, %v3050_v4  ;;  %v790_v10 = vand.u32 4294901760, %v789_v6  ;;  %v809_v13 = vand.u32 4294901760, %v3065_v9 }
  0x2f   : > { %2553 = vmatprep.mubr.msk.f32.mxu1 %vm2825_vm0, %v2824_v3  ;;  %2575 = vmatprep.subr.mxu1 %v2824_v3 }
  0x30   : > { %2554 = vmatmul.mubr.f32.vlgmr.msra.gmra.mxu1 %v224_v22  ;;  %2556 = vmatprep.subr.mxu0 %v2824_v3  ;;  %v803_v12 = vsub.f32 %v3050_v4, %v802_v8  ;;  %v810_v15 = vsub.f32 %v3065_v9, %v809_v13 }
  0x31   : > { %2591 = vmatprep.mubr.msk.f32.mxu1 %vm2825_vm0, %v2824_v3  ;;  %2572 = vmatprep.mubr.msk.f32.mxu0 %vm2825_vm0, %v2824_v3 }
  0x32   : > { %2557 = vmatpush3.msra.mxu0 %v2965_v33  ;;  %2576 = vmatpush3.msra.mxu1 %v762_v47  ;;  %v804_v14 = vand.u32 4294901760, %v803_v12  ;;  %v811_v16 = vand.u32 4294901760, %v810_v15  ;;  %v2352_v12 = vld [vmem:[%s3355_s0 + $0x91] ss:$0 sm:$0xff] }
  0x33   : > { %2558 = vmatprep.subr.mxu0 %v2824_v3  ;;  %2577 = vmatprep.subr.mxu1 %v2824_v3 }
  0x34   : > { %2559 = vmatpush3.msra.mxu0 %v2973_v36  ;;  %2578 = vmatpush3.msra.mxu1 %v769_v53 }
  0x35   : > { %2560 = vmatprep.subr.mxu0 %v2824_v3  ;;  %2579 = vmatprep.subr.mxu1 %v2824_v3 }
  0x36   : > { %2561 = vmatpush3.msra.mxu0 %v2984_v40  ;;  %2580 = vmatpush3.msra.mxu1 %v776_v59 }
  0x37   : > { %2562 = vmatprep.subr.mxu0 %v2824_v3  ;;  %2581 = vmatprep.subr.mxu1 %v2824_v3 }
  0x38   : > { %2563 = vmatpush3.msra.mxu0 %v2998_v45  ;;  %2582 = vmatpush3.msra.mxu1 %v783_v1 }
  0x39   : > { %2564 = vmatprep.subr.mxu0 %v2824_v3  ;;  %2583 = vmatprep.subr.mxu1 %v2824_v3 }
  0x3a   : > { %2565 = vmatpush3.msra.mxu0 %v3013_v51  ;;  %2584 = vmatpush3.msra.mxu1 %v790_v10 }
  0x3b   : > { %2566 = vmatprep.subr.mxu0 %v2824_v3  ;;  %2585 = vmatprep.subr.mxu1 %v2824_v3 }
  0x3c   : > { %2567 = vmatpush3.msra.mxu0 %v3023_v56  ;;  %2586 = vmatpush3.msra.mxu1 %v797_v11 }
  0x3d   : > { %2568 = vmatprep.subr.mxu0 %v2824_v3  ;;  %2587 = vmatprep.subr.mxu1 %v2824_v3 }
  0x3e   : > { %2569 = vmatpush3.msra.mxu0 %v3039_v62  ;;  %2588 = vmatpush3.msra.mxu1 %v804_v14 }
  0x3f   : > { %2570 = vmatprep.subr.mxu0 %v2824_v3  ;;  %2589 = vmatprep.subr.mxu1 %v2824_v3 }
  0x40   : > { %2571 = vmatpush3.msra.mxu0 %v3052_v5  ;;  %2590 = vmatpush3.msra.mxu1 %v811_v16 }
  0x41   : > { %2594 = vmatprep.subr.mxu0 %v2824_v3  ;;  %2613 = vmatprep.subr.mxu1 %v2824_v3 }
  0xda   : > { %v230_v17 = vpop.f32.mrf.mxu0 }
  0xdb   : > { %v231_v22 = vadd.f32 %v2351_v21, %v230_v17 }
  0xdc   : > { %v2500_v19 = vpop.f32.mrf.mxu0 }
  0xdd   : > { %v321_v18 = vpop.f32.mrf.mxu1 }
  0xde   : > { %v322_v26 = vadd.f32 %v321_v18, %v231_v22 }
  0xdf   : > { %v2511_v20 = vpop.f32.mrf.mxu1 }
  0xe4   : > { %v401_v23 = vpop.f32.mrf.mxu0 }
  0xe5   : > { %v402_v28 = vadd.f32 %v401_v23, %v322_v26 }
  0xe6   : > { %v478_v24 = vpop.f32.mrf.mxu1  ;;  %v2522_v25 = vpop.f32.mrf.mxu0 }
  0xe7   : > { %v479_v29 = vadd.f32 %v478_v24, %v402_v28 }
  0xe8   : > { %v2533_v27 = vpop.f32.mrf.mxu1 }
  0xee   : > { %v561_v30 = vpop.f32.mrf.mxu0 }
  0xef   : > { %v562_v31 = vadd.f32 %v561_v30, %v479_v29  ;;  %v1695_v30 = vld [vmem:[%s3355_s0 + $0x88] sm:$0xff] }
  0xf0   : > { %v636_v32 = vpop.f32.mrf.mxu1  ;;  %v2544_v34 = vpop.f32.mrf.mxu0 }
  0xf1   : > { %v637_v37 = vadd.f32 %v636_v32, %v562_v31  ;;  %v1734_v31 = vand.u32 4294901760, %v1695_v30  ;;  %v1694_v32 = vld [vmem:[%s3355_s0 + $0x80] sm:$0xff] }
  0xf2   : > { %v2555_v41 = vpop.f32.mrf.mxu1 }
  0xf3   : > { %v640_v42 = vmax.f32 %v637_v37, 0.0  ;;  %v3294_v34 = vsub.f32 %v1695_v30, %v1734_v31  ;;  %v1737_v37 = vand.u32 4294901760, %v1694_v32 }
  0xf5   : > { %v656_v46 = vsel %vm654_vm2, %v640_v42, 0  ;;  %v1813_v41 = vand.u32 4294901760, %v3294_v34  ;;  %v1819_v42 = vsub.f32 %v1694_v32, %v1737_v37 }
  0xf6   : > { %v3086_v47 = vand.u32 4294901760, %v656_v46 }
  0xf8   : > { %v732_v48 = vsub.f32 %v656_v46, %v3086_v47  ;;  %2592 = vmatmul.mubr.f32.vlgmr.msra.gmra.mxu1 %v3086_v47  ;;  %v1814_v46 = vsub.f32 %v3294_v34, %v1813_v41 }
  0xf9   : > { %2614 = vmatpush3.msra.mxu1 %v2965_v33  ;;  %2629 = vmatprep.mubr.msk.f32.mxu1 %vm2825_vm0, %v2824_v3 }
  0xfa   : > { %v733_v52 = vand.u32 4294901760, %v732_v48  ;;  %2615 = vmatprep.subr.mxu1 %v2824_v3 }
  0xfb   : > { %2616 = vmatpush3.msra.mxu1 %v2973_v36 }
  0xfc   : > { %2617 = vmatprep.subr.mxu1 %v2824_v3  ;;  %v734_v53 = vsub.f32 %v732_v48, %v733_v52 }
  0xfd   : > { %2618 = vmatpush3.msra.mxu1 %v2984_v40 }
  0xfe   : > { %2619 = vmatprep.subr.mxu1 %v2824_v3  ;;  %v735_v54 = vand.u32 4294901760, %v734_v53 }
  0xff   : > { %2620 = vmatpush3.msra.mxu1 %v2998_v45 }
 0x100   : > { %2621 = vmatprep.subr.mxu1 %v2824_v3  ;;  %2573 = vmatmul.mubr.f32.vlgmr.msra.gmra.mxu0 %v735_v54 }
 0x101   : > { %2595 = vmatpush3.msra.mxu0 %v2971_v35  ;;  %2622 = vmatpush3.msra.mxu1 %v3013_v51 }
 0x102   : > { %2596 = vmatprep.subr.mxu0 %v2824_v3  ;;  %2623 = vmatprep.subr.mxu1 %v2824_v3 }
 0x103   : > { %2597 = vmatpush3.msra.mxu0 %v2982_v39  ;;  %2624 = vmatpush3.msra.mxu1 %v3023_v56 }
 0x104   : > { %2598 = vmatprep.subr.mxu0 %v2824_v3  ;;  %2625 = vmatprep.subr.mxu1 %v2824_v3 }
 0x105   : > { %2599 = vmatpush3.msra.mxu0 %v2996_v44  ;;  %2626 = vmatpush3.msra.mxu1 %v3039_v62 }
 0x106   : > { %2600 = vmatprep.subr.mxu0 %v2824_v3  ;;  %2627 = vmatprep.subr.mxu1 %v2824_v3 }
 0x107   : > { %2601 = vmatpush3.msra.mxu0 %v3010_v50  ;;  %2628 = vmatpush3.msra.mxu1 %v3052_v5 }
 0x108   : > { %2602 = vmatprep.subr.mxu0 %v2824_v3  ;;  %2630 = vmatmul.mubr.f32.vlgmr.msra.gmra.mxu1 %v733_v52 }
 0x109   : > { %2651 = vmatprep.subr.mxu1 %v2824_v3  ;;  %2603 = vmatpush3.msra.mxu0 %v3027_v57 }
 0x10a   : > { %2652 = vmatpush3.msra.mxu1 %v2965_v33  ;;  %2604 = vmatprep.subr.mxu0 %v2824_v3  ;;  %v1199_v33 = vld [vmem:[%s3355_s0 + $0x78] sm:$0xff] }
 0x10b   : > { %2653 = vmatprep.subr.mxu1 %v2824_v3  ;;  %2605 = vmatpush3.msra.mxu0 %v3037_v61  ;;  %v3179_v35 = vand.u32 4294901760, %v1199_v33 }
 0x10c   : > { %2654 = vmatpush3.msra.mxu1 %v2973_v36  ;;  %2606 = vmatprep.subr.mxu0 %v2824_v3  ;;  %v1198_v36 = vld [vmem:[%s3355_s0 + $0x70] sm:$0xff] }
 0x10d   : > { %2655 = vmatprep.subr.mxu1 %v2824_v3  ;;  %2607 = vmatpush3.msra.mxu0 %v3050_v4  ;;  %v3187_v39 = vand.u32 4294901760, %v1198_v36 }
 0x10e   : > { %2656 = vmatpush3.msra.mxu1 %v2984_v40  ;;  %2608 = vmatprep.subr.mxu0 %v2824_v3  ;;  %v1197_v40 = vld [vmem:[%s3355_s0 + $0x68] sm:$0xff] }
 0x10f   : > { %2657 = vmatprep.subr.mxu1 %v2824_v3  ;;  %2609 = vmatpush3.msra.mxu0 %v3065_v9  ;;  %v3196_v44 = vsub.f32 %v1198_v36, %v3187_v39 }
 0x110   : > { %2610 = vmatprep.mubr.msk.f32.mxu0 %vm2825_vm0, %v2824_v3  ;;  %2658 = vmatpush3.msra.mxu1 %v2998_v45  ;;  %v3198_v45 = vand.u32 4294901760, %v1197_v40 }
 0x111   : > { %2611 = vmatmul.mubr.f32.vlgmr.msra.gmra.mxu0 %v732_v48  ;;  %2632 = vmatprep.subr.mxu0 %v2824_v3  ;;  %v1815_v48 = vand.u32 4294901760, %v1814_v46  ;;  %v2830_v46 = vmov 14  }
 0x112   : > { %2659 = vmatprep.subr.mxu1 %v2824_v3  ;;  %2633 = vmatpush3.msra.mxu0 %v760_v38  ;;  %v3185_v38 = vsub.f32 %v1199_v33, %v3179_v35 }
 0x113   : > { %2660 = vmatpush3.msra.mxu1 %v3013_v51  ;;  %2634 = vmatprep.subr.mxu0 %v2824_v3  ;;  %v1321_v51 = vand.u32 4294901760, %v3196_v44 }
 0x114   : > { %2661 = vmatprep.subr.mxu1 %v2824_v3  ;;  %2635 = vmatpush3.msra.mxu0 %v767_v43  ;;  %v1314_v43 = vand.u32 4294901760, %v3185_v38 }
 0x115   : > { %2662 = vmatpush3.msra.mxu1 %v3023_v56  ;;  %2636 = vmatprep.subr.mxu0 %v2824_v3  ;;  %v1322_v58 = vsub.f32 %v3196_v44, %v1321_v51 }
 0x116   : > { %2663 = vmatprep.subr.mxu1 %v2824_v3  ;;  %2637 = vmatpush3.msra.mxu0 %v774_v49  ;;  %v1196_v49 = vld [vmem:[%s3355_s0 + $0x60] sm:$0xff]  ;;  %v1315_v50 = vsub.f32 %v3185_v38, %v1314_v43 }
 0x117   : > { %2664 = vmatpush3.msra.mxu1 %v3039_v62  ;;  %2638 = vmatprep.subr.mxu0 %v2824_v3  ;;  %v3212_v56 = vand.u32 4294901760, %v1196_v49  ;;  %v1323_v61 = vand.u32 4294901760, %v1322_v58 }
 0x118   : > { %2665 = vmatprep.subr.mxu1 %v2824_v3  ;;  %2639 = vmatpush3.msra.mxu0 %v781_v55  ;;  %v3210_v55 = vsub.f32 %v1197_v40, %v3198_v45  ;;  %v1316_v57 = vand.u32 4294901760, %v1315_v50  ;;  %v2353_v40 = vld [vmem:[%s3355_s0 + $0x92] ss:$0 sm:$0xff] }
 0x119   : > { %2666 = vmatpush3.msra.mxu1 %v3052_v5  ;;  %2667 = vmatprep.mubr.msk.f32.mxu1 %vm2825_vm0, %v2824_v3  ;;  %v3221_v60 = vsub.f32 %v1196_v49, %v3212_v56 }
 0x11a   : > { %2640 = vmatprep.subr.mxu0 %v2824_v3  ;;  %2668 = vmatmul.mubr.f32.vlgmr.msra.gmra.mxu1 %v3086_v47  ;;  %v1328_v59 = vand.u32 4294901760, %v3210_v55 }
 0x11b   : > { %2641 = vmatpush3.msra.mxu0 %v788_v63  ;;  %2648 = vmatprep.mubr.msk.f32.mxu0 %vm2825_vm0, %v2824_v3  ;;  %v1335_v63 = vand.u32 4294901760, %v3221_v60 }
 0x11c   : > { %2642 = vmatprep.subr.mxu0 %v2824_v3  ;;  %2681 = vmatprep.subr.mxu1 %v2824_v3  ;;  %v1329_v62 = vsub.f32 %v3210_v55, %v1328_v59 }
 0x11d   : > { %2643 = vmatpush3.msra.mxu0 %v795_v2  ;;  %2689 = vmatprep.mubr.msk.f32.mxu1 %vm2825_vm0, %v2824_v3  ;;  %v1336_v1 = vsub.f32 %v3221_v60, %v1335_v63 }
 0x11e   : > { %2644 = vmatprep.subr.mxu0 %v2824_v3  ;;  %2682 = vmatpush3.msra.mxu1 %v1316_v57  ;;  %v1330_v0 = vand.u32 4294901760, %v1329_v62 }
 0x11f   : > { %2645 = vmatpush3.msra.mxu0 %v802_v8  ;;  %2683 = vmatprep.subr.mxu1 %v2824_v3  ;;  %v1337_v2 = vand.u32 4294901760, %v1336_v1 }
 0x120   : > { %2646 = vmatprep.subr.mxu0 %v2824_v3  ;;  %2684 = vmatpush3.msra.mxu1 %v1323_v61 }
 0x121   : > { %2647 = vmatpush3.msra.mxu0 %v809_v13  ;;  %2685 = vmatprep.subr.mxu1 %v2824_v3 }
 0x122   : > { %2649 = vmatmul.mubr.f32.vlgmr.msra.gmra.mxu0 %v3086_v47  ;;  %2670 = vmatprep.subr.mxu0 %v2824_v3  ;;  %v1820_v47 = vand.u32 4294901760, %v1819_v42 }
 0x123   : > { %2678 = vmatprep.mubr.msk.f32.mxu0 %vm2825_vm0, %v2824_v3  ;;  %2671 = vmatpush3.msra.mxu0 %v3179_v35 }
 0x124   : > { %2672 = vmatprep.subr.mxu0 %v2824_v3  ;;  %2686 = vmatpush3.msra.mxu1 %v1330_v0  ;;  %v1821_v52 = vsub.f32 %v1819_v42, %v1820_v47 }
 0x125   : > { %2673 = vmatpush3.msra.mxu0 %v3187_v39  ;;  %2687 = vmatprep.subr.mxu1 %v2824_v3 }
 0x126   : > { %2674 = vmatprep.subr.mxu0 %v2824_v3  ;;  %2688 = vmatpush3.msra.mxu1 %v1337_v2  ;;  %v1822_v53 = vand.u32 4294901760, %v1821_v52 }
 0x127   : > { %2675 = vmatpush3.msra.mxu0 %v3198_v45  ;;  %2703 = vmatprep.subr.mxu1 %v2824_v3 }
 0x128   : > { %2676 = vmatprep.subr.mxu0 %v2824_v3  ;;  %2798 = vset.pattern.permute.xlu0 %v2830_v46 }
 0x129   : > { %2677 = vmatpush3.msra.mxu0 %v3212_v56 }
 0x12a   : > { %2692 = vmatprep.subr.mxu0 %v2824_v3 }
 0x1b8   : > { %v848_v4 = vpop.f32.mrf.mxu1 }
 0x1ba   : > { %v2593_v5 = vpop.f32.mrf.mxu1 }
 0x1c0   : > { %v737_v6 = vpop.f32.mrf.mxu0 }
 0x1c1   : > { %v738_v13 = vadd.f32 %v2352_v12, %v737_v6 }
 0x1c2   : > { %v2574_v7 = vpop.f32.mrf.mxu0 }
 0x1c3   : > { %v849_v15 = vadd.f32 %v848_v4, %v738_v13 }
 0x1c8   : > { %v1017_v8 = vpop.f32.mrf.mxu1 }
 0x1ca   : > { %v2631_v9 = vpop.f32.mrf.mxu1 }
 0x1cb   : > { %v2354_v9 = vld [vmem:[%s3355_s0 + $0x93] ss:$0 sm:$0xff] }
 0x1d1   : > { %v936_v10 = vpop.f32.mrf.mxu0 }
 0x1d2   : > { %v937_v17 = vadd.f32 %v936_v10, %v849_v15 }
 0x1d3   : > { %v2612_v11 = vpop.f32.mrf.mxu0 }
 0x1d4   : > { %v1018_v18 = vadd.f32 %v1017_v8, %v937_v17 }
 0x1da   : > { %v1191_v14 = vpop.f32.mrf.mxu1 }
 0x1dc   : > { %v2669_v16 = vpop.f32.mrf.mxu1 }
 0x1e2   : > { %v1112_v19 = vpop.f32.mrf.mxu0 }
 0x1e3   : > { %v1113_v20 = vadd.f32 %v1112_v19, %v1018_v18 }
 0x1e4   : > { %v2650_v21 = vpop.f32.mrf.mxu0 }
 0x1e5   : > { %v1192_v22 = vadd.f32 %v1191_v14, %v1113_v20 }
 0x1e7   : > { %v1195_v23 = vmax.f32 %v1192_v22, 0.0 }
 0x1e9   : > { %v1206_v24 = vsel %vm151_vm1, %v1195_v23, 0 }
 0x1ea   : > { %v1277_v25 = vand.u32 4294901760, %v1206_v24 }
 0x1ec   : > { %v1278_v26 = vsub.f32 %v1206_v24, %v1277_v25  ;;  %2690 = vmatmul.mubr.f32.vlgmr.msra.gmra.mxu1 %v1277_v25 }
 0x1ed   : > { %2704 = vmatpush3.msra.mxu1 %v3179_v35  ;;  %2711 = vmatprep.mubr.msk.f32.mxu1 %vm2825_vm0, %v2824_v3 }
 0x1ee   : > { %2705 = vmatprep.subr.mxu1 %v2824_v3  ;;  %v1279_v27 = vand.u32 4294901760, %v1278_v26 }
 0x1ef   : > { %2706 = vmatpush3.msra.mxu1 %v3187_v39 }
 0x1f0   : > { %2707 = vmatprep.subr.mxu1 %v2824_v3  ;;  %v1280_v28 = vsub.f32 %v1278_v26, %v1279_v27 }
 0x1f1   : > { %2708 = vmatpush3.msra.mxu1 %v3198_v45 }
 0x1f2   : > { %2709 = vmatprep.subr.mxu1 %v2824_v3  ;;  %v1281_v29 = vand.u32 4294901760, %v1280_v28 }
 0x1f3   : > { %2710 = vmatpush3.msra.mxu1 %v3212_v56 }
 0x1f4   : > { %2712 = vmatmul.mubr.f32.vlgmr.msra.gmra.mxu1 %v1279_v27  ;;  %2725 = vmatprep.subr.mxu1 %v2824_v3 }
 0x1f5   : > { %2679 = vmatmul.mubr.f32.vlgmr.msra.gmra.mxu0 %v1281_v29  ;;  %2726 = vmatpush3.msra.mxu1 %v3179_v35 }
 0x1f6   : > { %2693 = vmatpush3.msra.mxu0 %v3185_v38  ;;  %2727 = vmatprep.subr.mxu1 %v2824_v3 }
 0x1f7   : > { %2694 = vmatprep.subr.mxu0 %v2824_v3  ;;  %2728 = vmatpush3.msra.mxu1 %v3187_v39 }
 0x1f8   : > { %2695 = vmatpush3.msra.mxu0 %v3196_v44  ;;  %2729 = vmatprep.subr.mxu1 %v2824_v3 }
 0x1f9   : > { %2696 = vmatprep.subr.mxu0 %v2824_v3  ;;  %2730 = vmatpush3.msra.mxu1 %v3198_v45 }
 0x1fa   : > { %2697 = vmatpush3.msra.mxu0 %v3210_v55  ;;  %2731 = vmatprep.subr.mxu1 %v2824_v3 }
 0x1fb   : > { %2698 = vmatprep.subr.mxu0 %v2824_v3  ;;  %2700 = vmatprep.mubr.msk.f32.mxu0 %vm2825_vm0, %v2824_v3 }
 0x1fc   : > { %2699 = vmatpush3.msra.mxu0 %v3221_v60  ;;  %2732 = vmatpush3.msra.mxu1 %v3212_v56 }
 0x1fd   : > { %2733 = vmatprep.mubr.msk.f32.mxu1 %vm2825_vm0, %v2824_v3  ;;  %2701 = vmatmul.mubr.f32.vlgmr.msra.gmra.mxu0 %v1278_v26 }
 0x1fe   : > { %2714 = vmatprep.subr.mxu0 %v2824_v3  ;;  %2734 = vmatmul.mubr.f32.vlgmr.msra.gmra.mxu1 %v1277_v25 }
 0x1ff   : > { %2715 = vmatpush3.msra.mxu0 %v1314_v43  ;;  %2722 = vmatprep.mubr.msk.f32.mxu0 %vm2825_vm0, %v2824_v3 }
 0x200   : > { %2716 = vmatprep.subr.mxu0 %v2824_v3  ;;  %2743 = vmatprep.subr.mxu1 %v2824_v3 }
 0x201   : > { %2717 = vmatpush3.msra.mxu0 %v1321_v51  ;;  %2747 = vmatprep.mubr.msk.f32.mxu1 %vm2825_vm0, %v2824_v3 }
 0x202   : > { %2718 = vmatprep.subr.mxu0 %v2824_v3  ;;  %2744 = vmatpush3.msra.mxu1 %v1815_v48 }
 0x203   : > { %2719 = vmatpush3.msra.mxu0 %v1328_v59  ;;  %2745 = vmatprep.subr.mxu1 %v2824_v3 }
 0x204   : > { %2720 = vmatprep.subr.mxu0 %v2824_v3  ;;  %2746 = vmatpush3.msra.mxu1 %v1822_v53 }
 0x205   : > { %2721 = vmatpush3.msra.mxu0 %v1335_v63  ;;  %2757 = vmatprep.subr.mxu1 %v2824_v3 }
 0x206   : > { %2723 = vmatmul.mubr.f32.vlgmr.msra.gmra.mxu0 %v1277_v25  ;;  %2736 = vmatprep.subr.mxu0 %v2824_v3 }
 0x207   : > { %2740 = vmatprep.mubr.msk.f32.mxu0 %vm2825_vm0, %v2824_v3  ;;  %2737 = vmatpush3.msra.mxu0 %v1734_v31 }
 0x208   : > { %2738 = vmatprep.subr.mxu0 %v2824_v3 }
 0x209   : > { %2739 = vmatpush3.msra.mxu0 %v1737_v37 }
 0x20a   : > { %2750 = vmatprep.subr.mxu0 %v2824_v3 }
 0x2ac   : > { %v1374_v54 = vpop.f32.mrf.mxu1 }
 0x2ae   : > { %v2691_v33 = vpop.f32.mrf.mxu1 }
 0x2b4   : > { %v1531_v35 = vpop.f32.mrf.mxu1 }
 0x2b5   : > { %v1283_v36 = vpop.f32.mrf.mxu0 }
 0x2b6   : > { %v2713_v38 = vpop.f32.mrf.mxu1  ;;  %v1284_v43 = vadd.f32 %v2353_v40, %v1283_v36 }
 0x2b7   : > { %v2680_v39 = vpop.f32.mrf.mxu0 }
 0x2b8   : > { %v1375_v49 = vadd.f32 %v1374_v54, %v1284_v43 }
 0x2bd   : > { %v1454_v44 = vpop.f32.mrf.mxu0 }
 0x2be   : > { %v1689_v45 = vpop.f32.mrf.mxu1  ;;  %v1455_v55 = vadd.f32 %v1454_v44, %v1375_v49  ;;  %v2832_v49 = vmov 12  }
 0x2bf   : > { %v2702_v50 = vpop.f32.mrf.mxu0 }
 0x2c0   : > { %v2735_v51 = vpop.f32.mrf.mxu1  ;;  %v1532_v56 = vadd.f32 %v1531_v35, %v1455_v55  ;;  %v2833_v50 = vmov 13  }
 0x2c1   : > { %v2834_v51 = vmov 10  }
 0x2c6   : > { %v1614_v57 = vpop.f32.mrf.mxu0 }
 0x2c7   : > { %v1615_v58 = vadd.f32 %v1614_v57, %v1532_v56 }
 0x2c8   : > { %v2724_v59 = vpop.f32.mrf.mxu0 }
 0x2c9   : > { %v3305_v60 = vadd.f32 %v1689_v45, %v1615_v58  ;;  %v2831_v45 = vmov 15  }
 0x2cb   : > { %v1693_v61 = vmax.f32 %v3305_v60, 0.0  ;;  %v2212_v52 = vmul.f32 0.5, %v3305_v60 }
 0x2cd   : > { %v1703_v62 = vsel %vm1701_vm3, %v1693_v61, 0  ;;  %v2213_v33 = vmul.f32 1.442695, %v2212_v52 }
 0x2ce   : > { %v1772_v63 = vand.u32 4294901760, %v1703_v62 }
 0x2d0   : > { %v1773_v0 = vsub.f32 %v1703_v62, %v1772_v63  ;;  %2748 = vmatmul.mubr.f32.vlgmr.msra.gmra.mxu1 %v1772_v63 }
 0x2d1   : > { %2758 = vmatpush3.msra.mxu1 %v1734_v31  ;;  %2761 = vmatprep.mubr.msk.f32.mxu1 %vm2825_vm0, %v2824_v3 }
 0x2d2   : > { %2759 = vmatprep.subr.mxu1 %v2824_v3  ;;  %v1774_v1 = vand.u32 4294901760, %v1773_v0 }
 0x2d3   : > { %2760 = vmatpush3.msra.mxu1 %v1737_v37 }
 0x2d4   : > { %2762 = vmatmul.mubr.f32.vlgmr.msra.gmra.mxu1 %v1774_v1  ;;  %2771 = vmatprep.subr.mxu1 %v2824_v3  ;;  %v1775_v2 = vsub.f32 %v1773_v0, %v1774_v1 }
 0x2d5   : > { %2772 = vmatpush3.msra.mxu1 %v1734_v31  ;;  %2775 = vmatprep.mubr.msk.f32.mxu1 %vm2825_vm0, %v2824_v3 }
 0x2d6   : > { %2773 = vmatprep.subr.mxu1 %v2824_v3  ;;  %v1776_v4 = vand.u32 4294901760, %v1775_v2 }
 0x2d7   : > { %2774 = vmatpush3.msra.mxu1 %v1737_v37 }
 0x2d8   : > { %2741 = vmatmul.mubr.f32.vlgmr.msra.gmra.mxu0 %v1776_v4  ;;  %2776 = vmatmul.mubr.f32.vlgmr.msra.gmra.mxu1 %v1772_v63 }
 0x2d9   : > { %2751 = vmatpush3.msra.mxu0 %v3294_v34  ;;  %2754 = vmatprep.mubr.msk.f32.mxu0 %vm2825_vm0, %v2824_v3 }
 0x2da   : > { %2752 = vmatprep.subr.mxu0 %v2824_v3 }
 0x2db   : > { %2753 = vmatpush3.msra.mxu0 %v1819_v42  ;;  %v2829_v42 = vmov 11  }
 0x2dc   : > { %2764 = vmatprep.subr.mxu0 %v2824_v3  ;;  %2755 = vmatmul.mubr.f32.vlgmr.msra.gmra.mxu0 %v1773_v0  ;;  %v2815_v0 = vld [vmem:[%s2906_s22] sm:$0xff]  ;;  %s2357_s22 = sshll.u32 %s3359_s10, 4 }
 0x2dd   : > { %2765 = vmatpush3.msra.mxu0 %v1813_v41  ;;  %2768 = vmatprep.mubr.msk.f32.mxu0 %vm2825_vm0, %v2824_v3  ;;  %s140_s14 = scalar_lea.vmem %s3357_s2, %s2357_s22 }
 0x2de   : > { %2766 = vmatprep.subr.mxu0 %v2824_v3  ;;  %2799 = vset.pattern.permute.xlu1 %v2829_v42 }
 0x2df   : > { %2767 = vmatpush3.msra.mxu0 %v1820_v47 }
 0x2e0   : > { %2769 = vmatmul.mubr.f32.vlgmr.msra.gmra.mxu0 %v1772_v63 }
 0x390   : > { %v1859_v5 = vpop.f32.mrf.mxu1 }
 0x392   : > { %v2749_v6 = vpop.f32.mrf.mxu1 }
 0x394   : > { %v2010_v7 = vpop.f32.mrf.mxu1 }
 0x396   : > { %v2763_v8 = vpop.f32.mrf.mxu1 }
 0x398   : > { %v1778_v10 = vpop.f32.mrf.mxu0  ;;  %v2160_v11 = vpop.f32.mrf.mxu1 }
 0x399   : > { %v1779_v12 = vadd.f32 %v2354_v9, %v1778_v10 }
 0x39a   : > { %v2742_v13 = vpop.f32.mrf.mxu0  ;;  %v2777_v14 = vpop.f32.mrf.mxu1 }
 0x39b   : > { %v1860_v15 = vadd.f32 %v1859_v5, %v1779_v12 }
 0x39c   : > { %v1935_v16 = vpop.f32.mrf.mxu0 }
 0x39d   : > { %v1936_v17 = vadd.f32 %v1935_v16, %v1860_v15 }
 0x39e   : > { %v2756_v18 = vpop.f32.mrf.mxu0 }
 0x39f   : > { %v2011_v3 = vadd.f32 %v2010_v7, %v1936_v17 }
 0x3a0   : > { %v2087_v19 = vpop.f32.mrf.mxu0 }
 0x3a1   : > { %v2088_v20 = vadd.f32 %v2087_v19, %v2011_v3 }
 0x3a2   : > { %v2770_v21 = vpop.f32.mrf.mxu0 }
 0x3a3   : > { %v2161_v22 = vadd.f32 %v2160_v11, %v2088_v20 }
 0x3a5   : > { %v2164_v23 = vmul.f32 %v2161_v22, %v2161_v22 }
 0x3a7   : > { %2166 = vrot.lane.b32.xlu0 %v2164_v23, %s2826_s6 }
 0x3ab   : > { %2170 = vrot.lane.b32.xlu0 %v2164_v23, %s2827_s7 }
 0x419   : > { %v2167_v24 = vpop.permute.xlu0 %2166 }
 0x41a   : > { %v2169_v25 = vmax.f32 %v2164_v23, %v2167_v24 }
 0x41d   : > { %v2171_v26 = vpop.permute.xlu0 %2170 }
 0x41e   : > { %v2173_v27 = vmax.f32 %v2169_v25, %v2171_v26 }
 0x420   : > { %2178 = vrot.lane.b32.xlu1 %v2173_v27, %s2828_s8  ;;  %v2174_v47 = vsub.f32 %v2164_v23, %v2173_v27 }
 0x422   : > { %v2175_v48 = vmul.f32 1.442695, %v2174_v47 }
 0x424   : > { %2184 = vrot.lane.b32.xlu1 %v2173_v27, %s2827_s7 }
 0x492   : > { %v2179_v28 = vpop.permute.xlu1 %2178 }
 0x493   : > { %v2181_v29 = vsub.f32 %v2164_v23, %v2179_v28 }
 0x495   : > { %v2182_v30 = vmul.f32 1.442695, %v2181_v29 }
 0x496   : > { %v2185_v31 = vpop.permute.xlu1 %2184 }
 0x497   : > { %2805 = vpow2.f32 %v2182_v30  ;;  %v2187_v32 = vsub.f32 %v2164_v23, %v2185_v31 }
 0x499   : > { %v2188_v34 = vmul.f32 1.442695, %v2187_v32 }
 0x49b   : > { %2807 = vpow2.f32 %v2188_v34 }
 0x49c   : > { %2809 = vpow2.f32 %v2175_v48 }
 0x49d   : > { %2811 = vpow2.f32 %v2213_v33 }
 0x4a4   : > { %v2806_v37 = vpop.eup %2805 }
 0x4a5   : > { %2191 = vrot.lane.b32.xlu0 %v2806_v37, %s2826_s6 }
 0x4a8   : > { %v2808_v41 = vpop.eup %2807 }
 0x4a9   : > { %2196 = vrot.lane.b32.xlu1 %v2808_v41, %s2827_s7  ;;  %v2810_v54 = vpop.eup %2809 }
 0x4aa   : > { %v2812_v39 = vpop.eup %2811 }
 0x4ab   : > { %v2215_v44 = vadd.f32 1e-05, %v2812_v39 }
 0x517   : > { %v2192_v53 = vpop.permute.xlu0 %2191 }
 0x518   : > { %v2194_v35 = vadd.f32 %v2810_v54, %v2192_v53 }
 0x51b   : > { %v2197_v36 = vpop.permute.xlu1 %2196 }
 0x51c   : > { %v2199_v38 = vadd.f32 %v2197_v36, %v2194_v35 }
 0x51e   : > { %2813 = vrcp.f32 %v2199_v38 }
 0x52b   : > { %v2814_v40 = vpop.eup %2813 }
 0x52c   : > { %2208 = vrot.lane.b32.xlu1 %v2814_v40, %s2827_s7  ;;  %2204 = vrot.lane.b32.xlu0 %v2814_v40, %s2828_s8  ;;  %v2202_v43 = vmul.f32 %v2814_v40, %v2810_v54 }
 0x530   : > { %2239 = vperm.xlu1 %2799, %v3305_v60   ;;  %2234 = vperm.xlu0 %2798, %v2215_v44  }
 0x534   : > { %2800 = vset.pattern.permute.xlu1 %v2831_v45  ;;  %2801 = vset.pattern.permute.xlu0 %v2832_v49 }
 0x535   : > { %2254 = vperm.xlu1 %2800, %v2215_v44   ;;  %2259 = vperm.xlu0 %2801, %v3305_v60  }
 0x539   : > { %2802 = vset.pattern.permute.xlu0 %v2833_v50  ;;  %2803 = vset.pattern.permute.xlu1 %v2834_v51 }
 0x53a   : > { %2218 = vperm.xlu0 %2802, %v2215_v44  }
 0x53e   : > { %2804 = vset.pattern.permute.xlu0 %v2832_v49 }
 0x59e   : > { %v2209_v55 = vpop.permute.xlu1 %2208  ;;  %v2205_v56 = vpop.permute.xlu0 %2204 }
 0x59f   : > { %v2211_v57 = vmul.f32 %v2808_v41, %v2209_v55  ;;  %v2207_v58 = vmul.f32 %v2806_v37, %v2205_v56 }
 0x5a1   : > { %2244 = vrot.lane.b32.xlu1 %v2207_v58, %s2828_s8  ;;  %v2280_v59 = vsel %vm151_vm1, %v2202_v43, %v2207_v58 }
 0x5a2   : > { %v2281_v61 = vsel %vm654_vm2, %v2280_v59, %v2211_v57 }
 0x5a5   : > { %2264 = vrot.lane.b32.xlu1 %v2211_v57, %s2828_s8 }
 0x5a9   : > { %2224 = vperm.xlu1 %2803, %v3305_v60  }
 0x5ab   : > { %v2240_v62 = vpop.permute.xlu1 %2239  ;;  %v2235_v63 = vpop.permute.xlu0 %2234 }
 0x5ac   : > { %v2237_v1 = vmul.f32 %v2815_v0, %v2235_v63 }
 0x5ad   : > { %2229 = vrot.lane.b32.xlu1 %v2202_v43, %s2828_s8 }
 0x5ae   : > { %v2242_v5 = vadd.f32 %v2240_v62, %v2237_v1 }
 0x5b0   : > { %v2255_v2 = vpop.permute.xlu1 %2254  ;;  %v2260_v8 = vpop.permute.xlu0 %2259 }
 0x5b1   : > { %v2257_v4 = vmul.f32 %v2815_v0, %v2255_v2 }
 0x5b3   : > { %v2262_v9 = vadd.f32 %v2260_v8, %v2257_v4 }
 0x5b5   : > { %v2219_v13 = vpop.permute.xlu0 %2218 }
 0x5b6   : > { %v2221_v14 = vmul.f32 %v2815_v0, %v2219_v13 }
 0x613   : > { %v2245_v6 = vpop.permute.xlu1 %2244 }
 0x614   : > { %v2247_v7 = vmul.f32 %v2245_v6, %v2242_v5 }
 0x616   : > { %2249 = vrot.lane.b32.xlu0 %v2247_v7, %s2826_s6 }
 0x617   : > { %v2265_v10 = vpop.permute.xlu1 %2264 }
 0x618   : > { %v2267_v11 = vmul.f32 %v2265_v10, %v2262_v9 }
 0x61a   : > { %2269 = vrot.lane.b32.xlu1 %v2267_v11, %s2827_s7 }
 0x61e   : > { %2277 = vrot.lane.b32.xlu1 %v3305_v60, %s2835_s11 }
 0x624   : > { %v2225_v12 = vpop.permute.xlu1 %2224 }
 0x625   : > { %v2227_v16 = vadd.f32 %v2225_v12, %v2221_v14 }
 0x628   : > { %v2230_v15 = vpop.permute.xlu1 %2229 }
 0x629   : > { %v2232_v18 = vmul.f32 %v2230_v15, %v2227_v16 }
 0x688   : > { %v2250_v17 = vpop.permute.xlu0 %2249 }
 0x689   : > { %v2252_v3 = vadd.f32 %v2250_v17, %v2232_v18 }
 0x68c   : > { %v2270_v19 = vpop.permute.xlu1 %2269 }
 0x68d   : > { %v2272_v20 = vadd.f32 %v2270_v19, %v2252_v3 }
 0x68f   : > { %2274 = vrot.lane.b32.xlu0 %v2272_v20, %s2827_s7 }
 0x690   : > { %v2278_v21 = vpop.permute.xlu1 %2277 }
 0x691   : > { %v2285_v60 = vsel %vm2284_vm4, %v2278_v21, 0.0 }
 0x692   : > { %2287 = vst [vmem:[%s140_s14 + $0x8] sm:$0xff] %v2285_v60 }
 0x701   : > { %v2275_v22 = vpop.permute.xlu0 %2274 }
 0x702   : > { %v2283_v23 = vsel %vm2282_vm5, %v2281_v61, %v2275_v22 }
 0x703   : > { %2286 = vst [vmem:[%s140_s14] sm:$0xff] %v2283_v23 }
 0x704 PF: > { %s12_s9 = sadd.s32 1, %s2822_s9  }
 0x705   : > { %p9_p4 = scmp.ge.s32.totalorder %s12_s9, 4  }
 0x707   :  { %11 = sbr.rel (!%p9_p4) target bundleno = 1 (0x1), region = 58 }

</bundles_post_ra>
